<compile_context>
chip_gen: v7x
topology: tpu7x:2x2x1
jax: 0.10.0
libtpu: 0.0.40
codegen_flags: <defaults>
</compile_context>

<pallas_src>
import functools

import jax
import jax.numpy as jnp
from jax.experimental import pallas as pl
from jax.experimental.pallas import tpu as pltpu


# ----------------------------------------------------------------------------
# VMEM budget (generation aware: v7x has only 64 MiB / TensorCore)
# ----------------------------------------------------------------------------
def _default_vmem_limit():
    try:
        cap = int(pltpu.get_tpu_info().vmem_capacity_bytes)
    except Exception:
        cap = 64 * 1024 * 1024
    return int(min(cap - 16 * 1024 * 1024, 64 * 1024 * 1024))


_VMEM_LIMIT = _default_vmem_limit()


def _pick_tile(dim, candidates):
    for c in candidates:
        if dim > c and dim % c == 0:
            return c
    return dim


# ----------------------------------------------------------------------------
# Pallas kernel 1: matmul (1x1 conv / im2col conv) + folded-BN + fused epilogue
#   acts: none | relu | sigmoid | add_relu | add_sigmoid | gate
#   gate:  (1 + att) * relu(y + res)
# ----------------------------------------------------------------------------
def _mm_kernel(*refs, act):
    if act == "gate":
        x_ref, w_ref, s_ref, b_ref, r_ref, a_ref, o_ref = refs
    elif act in ("add_relu", "add_sigmoid"):
        x_ref, w_ref, s_ref, b_ref, r_ref, o_ref = refs
        a_ref = None
    else:
        x_ref, w_ref, s_ref, b_ref, o_ref = refs
        r_ref = a_ref = None
    acc = jnp.dot(x_ref[...], w_ref[...], preferred_element_type=jnp.float32)
    y = acc * s_ref[...] + b_ref[...]
    if act == "relu":
        y = jnp.maximum(y, 0.0)
    elif act == "sigmoid":
        y = jax.nn.sigmoid(y)
    elif act == "add_relu":
        y = jnp.maximum(y + r_ref[...].astype(jnp.float32), 0.0)
    elif act == "add_sigmoid":
        y = jax.nn.sigmoid(y + r_ref[...].astype(jnp.float32))
    elif act == "gate":
        y = (1.0 + a_ref[...].astype(jnp.float32)) * jnp.maximum(
            y + r_ref[...].astype(jnp.float32), 0.0)
    o_ref[...] = y.astype(o_ref.dtype)


@functools.lru_cache(maxsize=None)
def _matmul_call(M, K, N, act, tm, tn, out_dtype_name):
    kern = functools.partial(_mm_kernel, act=act)
    n_extra = 2 if act == "gate" else (1 if act in ("add_relu", "add_sigmoid") else 0)
    in_specs = [
        pl.BlockSpec((tm, K), lambda i, j: (i, 0)),
        pl.BlockSpec((K, tn), lambda i, j: (0, j)),
        pl.BlockSpec((1, tn), lambda i, j: (0, j)),
        pl.BlockSpec((1, tn), lambda i, j: (0, j)),
    ]
    for _ in range(n_extra):
        in_specs.append(pl.BlockSpec((tm, tn), lambda i, j: (i, j)))
    f = pl.pallas_call(
        kern,
        out_shape=jax.ShapeDtypeStruct((M, N), jnp.dtype(out_dtype_name)),
        grid=(M // tm, N // tn),
        in_specs=in_specs,
        out_specs=pl.BlockSpec((tm, tn), lambda i, j: (i, j)),
        compiler_params=pltpu.CompilerParams(
            dimension_semantics=("parallel", "parallel"),
            vmem_limit_bytes=_VMEM_LIMIT,
        ),
    )
    return jax.jit(f)


def matmul_affine(x, w, scale, bias, act="none", res=None, att=None,
                  out_dtype=jnp.bfloat16):
    M, K = x.shape
    N = w.shape[1]
    tm = _pick_tile(M, (1024, 512, 256, 128))
    tn = _pick_tile(N, (512, 256, 128))
    fn = _matmul_call(M, K, N, act, tm, tn, jnp.dtype(out_dtype).name)
    args = [x.astype(jnp.bfloat16), w.astype(jnp.bfloat16),
            scale.reshape(1, N).astype(jnp.float32),
            bias.reshape(1, N).astype(jnp.float32)]
    if act in ("add_relu", "add_sigmoid", "gate"):
        args.append(res.astype(jnp.bfloat16))
    if act == "gate":
        args.append(att.astype(jnp.bfloat16))
    return fn(*args)


# ----------------------------------------------------------------------------
# Pallas kernel 2: depthwise / pair-grouped 3x3 conv on the VPU
# (9 shifted FMAs on a padded tile; BN + ReLU fused).  groups==C is pure
# depthwise; groups==C/2 (attention, 2 ch/group) additionally uses the
# pair-swapped input with the cross-channel weights.
# ----------------------------------------------------------------------------
def _grouped3x3_kernel(*refs, H, W, dil, paired):
    if paired:
        xp_ref, xs_ref, wa_ref, wb_ref, s_ref, b_ref, o_ref = refs
    else:
        xp_ref, wa_ref, s_ref, b_ref, o_ref = refs
        xs_ref = wb_ref = None
    x = xp_ref[...]
    xs = xs_ref[...] if paired else None
    acc = None
    t = 0
    for ky in range(3):
        for kx in range(3):
            dy, dx = ky * dil, kx * dil
            term = x[:, dy:dy + H, dx:dx + W, :] * wa_ref[t]
            if paired:
                term = term + xs[:, dy:dy + H, dx:dx + W, :] * wb_ref[t]
            acc = term if acc is None else acc + term
            t += 1
    y = acc * s_ref[...] + b_ref[...]
    y = jnp.maximum(y, 0.0)   # grouped 3x3 is always followed by BN + ReLU here
    o_ref[...] = y.astype(o_ref.dtype)


@functools.lru_cache(maxsize=None)
def _grouped3x3_call(Nb, H, W, C, dil, paired, out_dtype_name):
    Hp, Wp = H + 2 * dil, W + 2 * dil
    kern = functools.partial(_grouped3x3_kernel, H=H, W=W, dil=dil, paired=paired)
    xspec = pl.BlockSpec((1, Hp, Wp, C), lambda n: (n, 0, 0, 0))
    wspec = pl.BlockSpec((9, 1, 1, C), lambda n: (0, 0, 0, 0))
    vspec = pl.BlockSpec((1, 1, 1, C), lambda n: (0, 0, 0, 0))
    in_specs = [xspec] + ([xspec] if paired else []) + [wspec] \
               + ([wspec] if paired else []) + [vspec, vspec]
    f = pl.pallas_call(
        kern,
        out_shape=jax.ShapeDtypeStruct((Nb, H, W, C), jnp.dtype(out_dtype_name)),
        grid=(Nb,),
        in_specs=in_specs,
        out_specs=pl.BlockSpec((1, H, W, C), lambda n: (n, 0, 0, 0)),
        compiler_params=pltpu.CompilerParams(
            dimension_semantics=("parallel",),
            vmem_limit_bytes=_VMEM_LIMIT,
        ),
    )
    return jax.jit(f)


def dwconv3x3(x, w9, scale, bias):
    """Depthwise 3x3 (groups == channels), pad 1, dil 1, fused BN + ReLU."""
    N, H, W, C = x.shape
    xp = jnp.pad(x.astype(jnp.float32), ((0, 0), (1, 1), (1, 1), (0, 0)))
    fn = _grouped3x3_call(N, H, W, C, 1, False, "bfloat16")
    return fn(xp, w9, scale.reshape(1, 1, 1, C), bias.reshape(1, 1, 1, C))


def gconv3x3_pair(x, wa, wb, scale, bias, dil):
    """Grouped 3x3 with 2 channels/group (C=64, groups=32), fused BN + ReLU."""
    N, H, W, C = x.shape
    p = dil
    xp = jnp.pad(x.astype(jnp.float32), ((0, 0), (p, p), (p, p), (0, 0)))
    Hp, Wp = H + 2 * p, W + 2 * p
    xs = xp.reshape(N, Hp, Wp, C // 2, 2)[..., ::-1].reshape(N, Hp, Wp, C)
    fn = _grouped3x3_call(N, H, W, C, dil, True, "bfloat16")
    return fn(xp, xs, wa, wb, scale.reshape(1, 1, 1, C), bias.reshape(1, 1, 1, C))


# ----------------------------------------------------------------------------
# Conv helpers (im2col glue in JAX, matmul in Pallas)
# ----------------------------------------------------------------------------
def conv1x1(x, w, scale, bias, act="none", res=None, att=None, out_dtype=jnp.bfloat16):
    N, H, W, C = x.shape
    Co = w.shape[1]
    r2 = res.reshape(N * H * W, Co) if res is not None else None
    a2 = att.reshape(N * H * W, Co) if att is not None else None
    y = matmul_affine(x.reshape(N * H * W, C), w, scale, bias, act, r2, a2, out_dtype)
    return y.reshape(N, H, W, Co)


def im2col3x3(x, dilation=1):
    N, H, W, C = x.shape
    p = dilation
    xp = jnp.pad(x, ((0, 0), (p, p), (p, p), (0, 0)))
    cols = []
    for dy in (-1, 0, 1):
        for dx in (-1, 0, 1):
            oy, ox = p + dy * dilation, p + dx * dilation
            cols.append(xp[:, oy:oy + H, ox:ox + W, :])
    return jnp.concatenate(cols, axis=-1)   # (N,H,W,9C) tap-major / channel-minor


def conv3x3(x, w_flat, scale, bias, act="none", dilation=1, out_dtype=jnp.bfloat16):
    # TODO(synk): dense-3x3 im2col is still materialized in HBM (bf16); in-kernel
    # tap accumulation with haloed tiles is left for a later revision.
    N, H, W, C = x.shape
    cols = im2col3x3(x.astype(jnp.bfloat16), dilation).reshape(N * H * W, 9 * C)
    y = matmul_affine(cols, w_flat, scale, bias, act, out_dtype=out_dtype)
    return y.reshape(N, H, W, w_flat.shape[1])


def conv1x1_plain(x, w, act="none", bias=None, out_dtype=jnp.bfloat16):
    cout = w.shape[1]
    b = bias if bias is not None else jnp.zeros((cout,), jnp.float32)
    return conv1x1(x, w, jnp.ones((cout,), jnp.float32), b, act, out_dtype=out_dtype)


def conv3x3_plain(x, w_flat, act="none", dilation=1, bias=None, out_dtype=jnp.bfloat16):
    cout = w_flat.shape[1]
    b = bias if bias is not None else jnp.zeros((cout,), jnp.float32)
    return conv3x3(x, w_flat, jnp.ones((cout,), jnp.float32), b, act, dilation, out_dtype)


def bilinear_resize(x, target_hw):
    N, _, _, C = x.shape
    y = jax.image.resize(x.astype(jnp.float32),
                         (N, target_hw[0], target_hw[1], C), method="bilinear")
    return y.astype(x.dtype)


# ----------------------------------------------------------------------------
# Deformable convolution (3x3, stride 1, pad 1, dil 1, deformable_groups=8).
# TODO(synk): bilinear offset sampling/gather stays in XLA; the im2col x weight
# matmul runs in the Pallas matmul kernel.
# ----------------------------------------------------------------------------
def deform_conv(x, offsets, w_flat, dg=8):
    N, H, W, C = x.shape
    K = 9
    Cpg = C // dg
    off = offsets.reshape(N, H, W, dg, K, 2).astype(jnp.float32)
    dy, dx = off[..., 0], off[..., 1]

    ky = jnp.repeat(jnp.arange(-1.0, 2.0), 3)
    kx = jnp.tile(jnp.arange(-1.0, 2.0), 3)
    base_y = jnp.arange(H, dtype=jnp.float32).reshape(1, H, 1, 1, 1)
    base_x = jnp.arange(W, dtype=jnp.float32).reshape(1, 1, W, 1, 1)
    sy = base_y + ky.reshape(1, 1, 1, 1, K) + dy   # (N,H,W,dg,K)
    sx = base_x + kx.reshape(1, 1, 1, 1, K) + dx

    xg = x.reshape(N, H, W, dg, Cpg).astype(jnp.float32)
    n_idx = jnp.arange(N).reshape(N, 1, 1, 1, 1)
    g_idx = jnp.arange(dg).reshape(1, 1, 1, dg, 1)

    def tap(yi, xi):
        valid = (yi >= 0) & (yi <= H - 1) & (xi >= 0) & (xi <= W - 1)
        yc = jnp.clip(yi, 0, H - 1).astype(jnp.int32)
        xc = jnp.clip(xi, 0, W - 1).astype(jnp.int32)
        v = xg[n_idx, yc, xc, g_idx]                     # (N,H,W,dg,K,Cpg)
        return v * valid[..., None].astype(jnp.float32)

    y0, x0 = jnp.floor(sy), jnp.floor(sx)
    wy1, wx1 = sy - y0, sx - x0
    wy0, wx0 = 1.0 - wy1, 1.0 - wx1
    samp = ((wy0 * wx0)[..., None] * tap(y0, x0)
            + (wy0 * wx1)[..., None] * tap(y0, x0 + 1.0)
            + (wy1 * wx0)[..., None] * tap(y0 + 1.0, x0)
            + (wy1 * wx1)[..., None] * tap(y0 + 1.0, x0 + 1.0))
    cols = jnp.transpose(samp, (0, 1, 2, 4, 3, 5)).reshape(N * H * W, K * C)
    cout = w_flat.shape[1]
    y = matmul_affine(cols, w_flat, jnp.ones((cout,), jnp.float32),
                      jnp.zeros((cout,), jnp.float32), "none")
    return y.reshape(N, H, W, cout)


# ----------------------------------------------------------------------------
# Deterministic parameter construction
# ----------------------------------------------------------------------------
class ParamGen:
    def __init__(self, seed=0):
        self._key = jax.random.PRNGKey(seed)

    def _next(self):
        self._key, k = jax.random.split(self._key)
        return k

    def conv1x1(self, cin, cout, std=None):
        std = (2.0 / cin) ** 0.5 if std is None else std
        w = jax.random.normal(self._next(), (cin, cout), jnp.float32) * std
        return w.astype(jnp.bfloat16)

    def conv3x3(self, cin, cout, std=None):
        std = (2.0 / (9 * cin)) ** 0.5 if std is None else std
        w = jax.random.normal(self._next(), (3, 3, cin, cout), jnp.float32) * std
        return w.reshape(9 * cin, cout).astype(jnp.bfloat16)

    def dwconv3x3(self, c, std=None):       # depthwise: groups == channels
        std = (2.0 / 9.0) ** 0.5 if std is None else std
        w = jax.random.normal(self._next(), (3, 3, c), jnp.float32) * std
        return w.reshape(9, 1, 1, c)

    def gconv_pair3x3(self, c, groups, std=None):   # 2 in / 2 out channels per group
        cig = c // groups
        std = (2.0 / (9 * cig)) ** 0.5 if std is None else std
        w = jax.random.normal(self._next(), (3, 3, groups, cig, cig), jnp.float32) * std
        # A[t, 2g+j] = w[t,g,j,j] (same-index channel), B[t, 2g+j] = w[t,g,1-j,j]
        wa = jnp.stack([w[..., 0, 0], w[..., 1, 1]], axis=-1).reshape(9, 1, 1, c)
        wb = jnp.stack([w[..., 1, 0], w[..., 0, 1]], axis=-1).reshape(9, 1, 1, c)
        return wa, wb

    def bn(self, c):   # eval-mode BN folded to per-channel scale/bias
        g = 1.0 + 0.01 * jax.random.normal(self._next(), (c,), jnp.float32)
        b = 0.01 * jax.random.normal(self._next(), (c,), jnp.float32)
        return g, b

    def bias(self, c):
        return 0.01 * jax.random.normal(self._next(), (c,), jnp.float32)


def init_refine(pg):
    s1, b1 = pg.bn(32); s2, b2 = pg.bn(32); s3, b3 = pg.bn(32)
    return dict(w1=pg.conv1x1(64, 32), s1=s1, b1=b1,
                w2=pg.dwconv3x3(32), s2=s2, b2=b2,        # depthwise (groups=32)
                w3=pg.conv1x1(32, 32), s3=s3, b3=b3)


def init_att_block(pg, dil, cout_last):
    s1, b1 = pg.bn(64); s2, b2 = pg.bn(64); s3, b3 = pg.bn(cout_last)
    w2a, w2b = pg.gconv_pair3x3(64, 32)
    return dict(w1=pg.conv1x1(64, 64), s1=s1, b1=b1,
                w2a=w2a, w2b=w2b, s2=s2, b2=b2,
                w3=pg.conv1x1(64, cout_last), s3=s3, b3=b3, dil=dil)


def init_attention(pg):
    sd, bd = pg.bn(32)
    return dict(b1=init_att_block(pg, 2, 64),
                b2=init_att_block(pg, 3, 64),
                b3=init_att_block(pg, 4, 32),
                wd=pg.conv1x1(64, 32), sd=sd, bd=bd)


def init_params(seed=0):
    pg = ParamGen(seed)

    def down(cin):
        s, b = pg.bn(32)
        return dict(w=pg.conv1x1(cin, 32), s=s, b=b)

    # TODO(synk): ResNeXt101 layers + 3001.pth checkpoint are unavailable; stand-in
    # strided 1x1-conv pyramid with matching channel counts / strides is used.
    backbone = dict(l0=pg.conv1x1(3, 64), l1=pg.conv1x1(64, 256),
                    l2=pg.conv1x1(256, 512), l3=pg.conv1x1(512, 1024),
                    l4=pg.conv1x1(1024, 2048),
                    down1=down(256), down2=down(512), down3=down(1024), down4=down(2048))

    def fuse():
        s, b = pg.bn(32)
        return dict(w=pg.conv3x3(96, 32), s=s, b=b)

    s_fa, b_fa = pg.bn(16)
    s_pr, b_pr = pg.bn(8)
    P = dict(
        backbone=backbone,
        off2d_4_1=pg.conv3x3(64, 144, std=0.01),
        off2d_4_2=pg.conv3x3(64, 144, std=0.01),
        off2d_4_3=pg.conv3x3(64, 144, std=0.01),
        off2d_3=pg.conv3x3(64, 144, std=0.01),
        off2d_21=pg.conv3x3(64, 144, std=0.01),
        off2d_11=pg.conv3x3(64, 144, std=0.01),
        # (off2d_22 / off2d_12 are defined but unused in the reference forward.)
        deconv_4=pg.conv3x3(32, 32),   # usage-implied 32-ch output (see header note)
        deconv_3=pg.conv3x3(32, 32),
        deconv_2=pg.conv3x3(32, 32),
        deconv_1=pg.conv3x3(32, 32),
        fuse4=fuse(), fuse3=fuse(), fuse2=fuse(), fuse1=fuse(),
        refine3_hl=init_refine(pg), refine2_hl=init_refine(pg), refine1_hl=init_refine(pg),
        refine2_lh=init_refine(pg), refine3_lh=init_refine(pg), refine4_lh=init_refine(pg),
        attention3_hl=init_attention(pg), attention2_hl=init_attention(pg),
        attention1_hl=init_attention(pg), attention2_lh=init_attention(pg),
        attention3_lh=init_attention(pg), attention4_lh=init_attention(pg),
        fuse_attention=dict(w1=pg.conv3x3(64, 16), s1=s_fa, b1=b_fa,
                            w2=pg.conv1x1(16, 2), b2=pg.bias(2)),
        predict=dict(w1=pg.conv3x3(32, 8), s1=s_pr, b1=b_pr,
                     w2=pg.conv1x1(8, 1), b2=pg.bias(1)),
    )
    return P


# ----------------------------------------------------------------------------
# Module forward passes
# ----------------------------------------------------------------------------
def _att_block(blk, x_in, res, final_act, y1=None):
    if y1 is None:
        y1 = conv1x1(x_in, blk["w1"], blk["s1"], blk["b1"], "relu")
    t = gconv3x3_pair(y1, blk["w2a"], blk["w2b"], blk["s2"], blk["b2"], blk["dil"])
    return conv1x1(t, blk["w3"], blk["s3"], blk["b3"], act=final_act, res=res)


def apply_attention(p, x, y1_block1=None):
    blk1 = _att_block(p["b1"], x, x, "add_relu", y1=y1_block1)
    blk2 = _att_block(p["b2"], blk1, blk1, "add_relu")
    dn = conv1x1(blk2, p["wd"], p["sd"], p["bd"], "none")
    return _att_block(p["b3"], blk2, dn, "add_sigmoid")


def refine_step(prev, other, rp, ap):
    prev = prev.astype(jnp.bfloat16)
    cat = jnp.concatenate([prev, other.astype(jnp.bfloat16)], axis=-1)
    # Widened first 1x1: refine.w1 (->32) and attention.block1.w1 (->64) share `cat`.
    w_cat = jnp.concatenate([rp["w1"], ap["b1"]["w1"]], axis=1)
    s_cat = jnp.concatenate([rp["s1"], ap["b1"]["s1"]])
    b_cat = jnp.concatenate([rp["b1"], ap["b1"]["b1"]])
    y = conv1x1(cat, w_cat, s_cat, b_cat, "relu")
    y_r, y_a = y[..., :32], y[..., 32:]
    att = apply_attention(ap, cat, y1_block1=y_a)
    y_r = dwconv3x3(y_r, rp["w2"], rp["s2"], rp["b2"])
    # fused epilogue: (1 + att) * relu(BN(conv) + prev)
    return conv1x1(y_r, rp["w3"], rp["s3"], rp["b3"], act="gate", res=prev, att=att)


def feature_extract(P, x):
    b = P["backbone"]
    l0 = conv1x1_plain(x[:, ::4, ::4, :], b["l0"], "relu")
    l1 = conv1x1_plain(l0, b["l1"], "relu")
    l2 = conv1x1_plain(l1[:, ::2, ::2, :], b["l2"], "relu")
    l3 = conv1x1_plain(l2[:, ::2, ::2, :], b["l3"], "relu")
    l4 = conv1x1_plain(l3[:, ::2, ::2, :], b["l4"], "relu")
    d4 = conv1x1(l4, b["down4"]["w"], b["down4"]["s"], b["down4"]["b"], "relu")
    d3 = conv1x1(l3, b["down3"]["w"], b["down3"]["s"], b["down3"]["b"], "relu")
    d2 = conv1x1(l2, b["down2"]["w"], b["down2"]["s"], b["down2"]["b"], "relu")
    d1 = conv1x1(l1, b["down1"]["w"], b["down1"]["s"], b["down1"]["b"], "relu")
    return d1, d2, d3, d4


def our_model_forward(P, clip, flow41, flow42):
    B = clip[0].shape[0]
    # Backbone: batch the three clip frames (shared weights) along M.
    xall = jnp.concatenate(clip, axis=0)
    d1, d2, d3, d4 = feature_extract(P, xall)
    f1, r1f1, r2f1 = d1[:B], d1[B:2 * B], d1[2 * B:]
    f2, r1f2, r2f2 = d2[:B], d2[B:2 * B], d2[2 * B:]
    f3, r1f3, r2f3 = d3[:B], d3[B:2 * B], d3[2 * B:]
    f4, r1f4, r2f4 = d4[:B], d4[B:2 * B], d4[2 * B:]

    # Level-4 alignment: both reference frames share weights -> batch along M.
    refs4 = jnp.concatenate([r1f4, r2f4], axis=0)
    f4d = jnp.concatenate([f4, f4], axis=0)
    flows = jnp.concatenate([flow41, flow42], axis=0).astype(jnp.float32)

    off = conv3x3_plain(jnp.concatenate([f4d, refs4], axis=-1), P["off2d_4_1"],
                        out_dtype=jnp.float32)
    Nf, Hf, Wf, Cf = off.shape
    # (off + flow.repeat(72)) / 2, without materializing the 72x-tiled flow tensor.
    off = ((off.reshape(Nf, Hf, Wf, Cf // 2, 2) + flows[:, :, :, None, :]) * 0.5
           ).reshape(Nf, Hf, Wf, Cf)
    d = deform_conv(refs4, off, P["deconv_4"])
    off = conv3x3_plain(jnp.concatenate([f4d, d], axis=-1), P["off2d_4_2"],
                        out_dtype=jnp.float32) + off
    d = deform_conv(refs4, off, P["deconv_4"])
    off = conv3x3_plain(jnp.concatenate([f4d, d], axis=-1), P["off2d_4_3"],
                        out_dtype=jnp.float32) + off
    d = deform_conv(refs4, off, P["deconv_4"])
    fea4_1, fea4_2 = d[:B], d[B:]

    def align_pair(fcur, fr1, fr2, off_w, dconv_w):
        fc = jnp.concatenate([fcur, fcur], axis=0)
        fr = jnp.concatenate([fr1, fr2], axis=0)
        o = conv3x3_plain(jnp.concatenate([fc, fr], axis=-1), off_w,
                          out_dtype=jnp.float32)
        dd = deform_conv(fr, o, dconv_w)
        return dd[:B], dd[B:]

    fea3_1, fea3_2 = align_pair(f3, r1f3, r2f3, P["off2d_3"], P["deconv_3"])
    fea2_1, fea2_2 = align_pair(f2, r1f2, r2f2, P["off2d_21"], P["deconv_2"])
    fea1_1, fea1_2 = align_pair(f1, r1f1, r2f1, P["off2d_11"], P["deconv_1"])

    def fuse(p, a, b, c):
        return conv3x3(jnp.concatenate([a, b, c], axis=-1), p["w"], p["s"], p["b"], "relu")

    f_fuse4 = fuse(P["fuse4"], f4, fea4_1, fea4_2)
    f_fuse3 = fuse(P["fuse3"], f3, fea3_1, fea3_2)
    f_fuse2 = fuse(P["fuse2"], f2, fea2_1, fea2_2)
    f_fuse1 = fuse(P["fuse1"], f1, fea1_1, fea1_2)

    def up_to(x, target):
        return bilinear_resize(x, (target.shape[1], target.shape[2]))

    # high -> low cascade
    r = up_to(f4, f3)
    r = refine_step(r, f_fuse3, P["refine3_hl"], P["attention3_hl"])
    r = refine_step(r, f_fuse3, P["refine3_hl"], P["attention3_hl"])
    r = up_to(r, f2)
    r = refine_step(r, f_fuse2, P["refine2_hl"], P["attention2_hl"])
    r = refine_step(r, f_fuse2, P["refine2_hl"], P["attention2_hl"])
    r = up_to(r, f1)
    r = refine_step(r, f_fuse1, P["refine1_hl"], P["attention1_hl"])
    refine1_hl_1 = refine_step(r, f_fuse1, P["refine1_hl"], P["attention1_hl"])

    # low -> high cascade
    down2 = up_to(f_fuse2, f1)
    r = refine_step(f1, down2, P["refine2_lh"], P["attention2_lh"])
    r = refine_step(r, down2, P["refine2_lh"], P["attention2_lh"])
    down3 = up_to(f_fuse3, f1)
    r = refine_step(r, down3, P["refine3_lh"], P["attention3_lh"])
    r = refine_step(r, down3, P["refine3_lh"], P["attention3_lh"])
    down4 = up_to(f_fuse4, f1)
    r = refine_step(r, down4, P["refine4_lh"], P["attention4_lh"])
    refine4_lh_1 = refine_step(r, down4, P["refine4_lh"], P["attention4_lh"])

    # Prediction heads share weights -> batch the two refine maps along M.
    both = jnp.concatenate([refine1_hl_1, refine4_lh_1], axis=0)
    pp = P["predict"]
    y = conv3x3(both, pp["w1"], pp["s1"], pp["b1"], "relu")
    # TODO(synk): nn.Dropout(0.1) applied as eval-mode identity.
    preds = conv1x1(y, pp["w2"], jnp.ones((1,), jnp.float32), pp["b2"], "none",
                    out_dtype=jnp.float32)
    predict1_hl, predict4_lh = preds[:B], preds[B:]

    fa = P["fuse_attention"]
    y = conv3x3(jnp.concatenate([refine1_hl_1, refine4_lh_1], axis=-1),
                fa["w1"], fa["s1"], fa["b1"], "relu")
    fuse_attention = conv1x1(y, fa["w2"], jnp.ones((2,), jnp.float32), fa["b2"],
                             "sigmoid", out_dtype=jnp.float32)

    pred_cat = jnp.concatenate([predict1_hl, predict4_lh], axis=-1)
    fuse_predict = jnp.sum(fuse_attention * pred_cat, axis=-1, keepdims=True)

    predict1_hl = up_to(predict1_hl, clip[0])
    predict4_lh = up_to(predict4_lh, clip[0])
    fuse_predict = up_to(fuse_predict, clip[0])
    return fuse_predict, predict1_hl, predict4_lh


# ----------------------------------------------------------------------------
if __name__ == "__main__":
    B, H, W = 2, 64, 64          # level-4 feature map is H/32 = 2
    key = jax.random.PRNGKey(0)
    k0, k1, k2, k3, k4 = jax.random.split(key, 5)

    clip = (jax.random.normal(k0, (B, H, W, 3), jnp.float32),
            jax.random.normal(k1, (B, H, W, 3), jnp.float32),
            jax.random.normal(k2, (B, H, W, 3), jnp.float32))
    flow41 = 0.5 * jax.random.normal(k3, (B, H // 32, W // 32, 2), jnp.float32)
    flow42 = 0.5 * jax.random.normal(k4, (B, H // 32, W // 32, 2), jnp.float32)

    params = init_params(seed=0)

    fuse_predict, predict1_hl, predict4_lh = our_model_forward(params, clip, flow41, flow42)
    jax.block_until_ready((fuse_predict, predict1_hl, predict4_lh))

    assert fuse_predict.shape == (B, H, W, 1)
    assert predict1_hl.shape == (B, H, W, 1)
    assert predict4_lh.shape == (B, H, W, 1)
    assert bool(jnp.all(jnp.isfinite(fuse_predict)))
    print("KERNEL_OK")
</pallas_src>

<mosaic_0001>
module attributes {stable_mosaic.version = 11 : i64} {
  func.func @_mm_kernel(%arg0: i32, %arg1: i32, %arg2: memref<512x3xbf16, #tpu.memory_space<vmem>>, %arg3: memref<3x64xbf16, #tpu.memory_space<vmem>>, %arg4: memref<1x64xf32, #tpu.memory_space<vmem>>, %arg5: memref<1x64xf32, #tpu.memory_space<vmem>>, %arg6: memref<512x64xbf16, #tpu.memory_space<vmem>>) attributes {dimension_semantics = [#tpu.dimension_semantics<parallel>, #tpu.dimension_semantics<parallel>], iteration_bounds = array<i64: 3, 1>, scalar_prefetch = 0 : i64, scratch_operands = 0 : i64, tpu.core_type = #tpu.core_type<tc>, window_params = [{transform_indices = @transform_0, window_bounds = array<i64: 512, 3>}, {transform_indices = @transform_1, window_bounds = array<i64: 3, 64>}, {transform_indices = @transform_2, window_bounds = array<i64: 1, 64>}, {transform_indices = @transform_3, window_bounds = array<i64: 1, 64>}, {transform_indices = @transform_4, window_bounds = array<i64: 512, 64>}]} {
    %c0 = arith.constant 0 : index
    %c0_0 = arith.constant 0 : index
    %0 = vector.load %arg2[%c0, %c0_0] : memref<512x3xbf16, #tpu.memory_space<vmem>>, vector<512x3xbf16>
    %c0_1 = arith.constant 0 : index
    %c0_2 = arith.constant 0 : index
    %1 = vector.load %arg3[%c0_1, %c0_2] : memref<3x64xbf16, #tpu.memory_space<vmem>>, vector<3x64xbf16>
    %cst = arith.constant dense<0.000000e+00> : vector<512x64xf32>
    %2 = tpu.matmul %0, %1, %cst {dimension_numbers = #tpu.dot_dimension_numbers<[1], [0], [0], [1], [0, 0, 1, 1], [], []>} : vector<512x3xbf16>, vector<3x64xbf16>, vector<512x64xf32> -> vector<512x64xf32>
    %c0_3 = arith.constant 0 : index
    %c0_4 = arith.constant 0 : index
    %3 = vector.load %arg4[%c0_3, %c0_4] : memref<1x64xf32, #tpu.memory_space<vmem>>, vector<1x64xf32>
    %4 = vector.broadcast %3 : vector<1x64xf32> to vector<512x64xf32>
    %5 = arith.mulf %2, %4 : vector<512x64xf32>
    %c0_5 = arith.constant 0 : index
    %c0_6 = arith.constant 0 : index
    %6 = vector.load %arg5[%c0_5, %c0_6] : memref<1x64xf32, #tpu.memory_space<vmem>>, vector<1x64xf32>
    %7 = vector.broadcast %6 : vector<1x64xf32> to vector<512x64xf32>
    %8 = arith.addf %5, %7 : vector<512x64xf32>
    %cst_7 = arith.constant 0.000000e+00 : f32
    %9 = vector.broadcast %cst_7 : f32 to vector<512x64xf32>
    %10 = arith.maximumf %8, %9 : vector<512x64xf32>
    %11 = arith.truncf %10 : vector<512x64xf32> to vector<512x64xbf16>
    %c0_8 = arith.constant 0 : index
    %c0_9 = arith.constant 0 : index
    %12 = vector.load %arg6[%c0_8, %c0_9] : memref<512x64xbf16, #tpu.memory_space<vmem>>, vector<512x64xbf16>
    tpu.vector_store %arg6[%c0_8, %c0_9], %11 {strides = array<i32>} : memref<512x64xbf16, #tpu.memory_space<vmem>>, vector<512x64xbf16>,
    return
  }
  func.func @transform_0(%arg0: i32, %arg1: i32) -> (i32, i32) {
    %c0_i32 = arith.constant 0 : i32
    %c0_i32_0 = arith.constant 0 : i32
    return %arg0, %c0_i32 : i32, i32
  }
  func.func @transform_1(%arg0: i32, %arg1: i32) -> (i32, i32) {
    %c0_i32 = arith.constant 0 : i32
    %c0_i32_0 = arith.constant 0 : i32
    return %c0_i32, %arg1 : i32, i32
  }
  func.func @transform_2(%arg0: i32, %arg1: i32) -> (i32, i32) {
    %c0_i32 = arith.constant 0 : i32
    %c0_i32_0 = arith.constant 0 : i32
    return %c0_i32, %arg1 : i32, i32
  }
  func.func @transform_3(%arg0: i32, %arg1: i32) -> (i32, i32) {
    %c0_i32 = arith.constant 0 : i32
    %c0_i32_0 = arith.constant 0 : i32
    return %c0_i32, %arg1 : i32, i32
  }
  func.func @transform_4(%arg0: i32, %arg1: i32) -> (i32, i32) {
    %c0_i32 = arith.constant 0 : i32
    return %arg0, %arg1 : i32, i32
  }
}

</mosaic_0001>

<bundles_post_ra>
// kernel: tpu_custom_call.1
= control target key start
LH: loop header
LB: loop body
LE: loop exit
PB: predicated region body
PF: predicated region fallthrough
CT: control target
= control target key end

     0   :  { %s1942_s15 = smov 0   ;;  %s1944_s16 = smov 0   ;;  %s2319_s0 = inlined_call_operand.vmem [shape: bf16[1536,3], index: 0, kind: input, shape index: {}]   ;;  %s2320_s1 = inlined_call_operand.vmem [shape: bf16[3,64], index: 1, kind: input, shape index: {}]   ;;  %s2321_s2 = inlined_call_operand.vmem [shape: f32[1,64], index: 2, kind: input, shape index: {}]   ;;  %s2322_s3 = inlined_call_operand.vmem [shape: f32[1,64], index: 3, kind: input, shape index: {}]   ;;  %s2323_s4 = inlined_call_operand.vmem [shape: bf16[1536,64], index: 4, kind: output, shape index: {}]  }
   0x1   :  { %s1946_s17 = smov 0  }
   0x2 LB: > { %s26_s18 = sadd.s32 1, %s1910_s16  ;;  %p1533_p0 = scmp.ge.s32.totalorder %s1914_s17, 1  ;;  %s1914_s17 = sphi %s1946_s17, %s14_s17   ;;  %s1910_s16 = sphi %s1944_s16, %s2325_s16   ;;  %s1906_s15 = sphi %s1942_s15, %s2324_s15  }
   0x3   : > { %p28_p1 = scmp.ge.s32.totalorder %s26_s18, 3  ;;  %p202_p2 = scmp.lt.s32.totalorder %s1914_s17, 4 }
   0x5   : > { %s2327_s18 = smov (%p28_p1, %s26_s18), 0  ;;  %p203_p3 = pnand %p1533_p0, %p202_p2 }
   0x6   : > { %v331_v0 = vld [vmem:[%s2320_s1] sm:$0x3] (!%p203_p3)  ;;  %vm589_vm0 = vcmask (!%p203_p3), 1040384   ;;  %vm590_vm1 = vcmask (!%p203_p3), 1041408   ;;  %s1534_s21 = sshll.u32 (!%p203_p3), %s1906_s15, 6  ;;  %v1916_v1 = vmov (!%p203_p3), 65535  }
   0x7   : > { %206 = sbr.rel (%p203_p3) target bundleno = 303 (0x12f), region = 36  ;;  %v591_v2 = vsel (!%p203_p3), %vm589_vm0, 4294967295, %v1916_v1  ;;  %p242_p4 = scmp.lt.s32.totalorder (!%p203_p3), %s1534_s21, 191  ;;  %vm492_vm2 = vcmask (!%p203_p3), 23552   ;;  %v2040_v37 = vld [vmem:[%s2321_s2] ss:$0 sm:$0xff] (!%p203_p3) }
   0x8   : > { %v592_v3 = vsel (!%p203_p3), %vm590_vm1, %v591_v2, 0  ;;  %v2045_v39 = vld [vmem:[%s2322_s3] ss:$0 sm:$0xff] (!%p203_p3)  ;;  %vm1347_vm3 = vcmask (!%p203_p3), 519168  }
   0x9   : > { %v594_v4 = vand.u32 (!%p203_p3), %v592_v3, %v331_v0 }
   0xb   : > { %1767 = vmatprep.subr.bf16.mxu0 (!%p203_p3), %v594_v4  ;;  %1833 = vmatprep.subr.bf16.mxu1 (!%p203_p3), %v594_v4 }
   0xc   : > { %1768 = vmatpush3.bf16.msra.mxu0 (!%p203_p3), %v594_v4  ;;  %1834 = vmatpush3.bf16.msra.mxu1 (!%p203_p3), %v594_v4 }
   0xe   : > { %s2329_s21 = smov (!%p242_p4, %s1534_s21), 191 }
   0xf   : > { %s1535_s22 = sshll.u32 %s2329_s21, 2 }
  0x10   : > { %s1971_s25 = scalar_lea.vmem %s2319_s0, %s1535_s22  ;;  %s2065_s6 = scalar_lea.vmem %s2323_s4, %s1535_s22 }
  0x11   : > { %v1860_v5 = vld [vmem:[%s1971_s25] sm:$0xff]   ;;  %v1862_v7 = vld [vmem:[%s1971_s25 + $0x8] sm:$0xff]   ;;  %v1864_v9 = vld [vmem:[%s1971_s25 + $0x10] sm:$0xff]  }
  0x12   : > { %v1861_v6 = vld [vmem:[%s1971_s25 + $0x80] sm:$0xff]   ;;  %1769 = vmatprep.mubr.msk.bf16.mxu0 %vm492_vm2, %v1860_v5  ;;  %v1863_v8 = vld [vmem:[%s1971_s25 + $0x88] sm:$0xff]   ;;  %v1865_v10 = vld [vmem:[%s1971_s25 + $0x90] sm:$0xff]  }
  0x13   : > { %1801 = vmatprep.mubr.msk.bf16.mxu1 %vm492_vm2, %v1861_v6  ;;  %1770 = vmatmul.mubr.msk.bf16.vlgmr.msra.gmra.mrb[0].mxu0 %vm492_vm2, %v1862_v7  ;;  %v1866_v11 = vld [vmem:[%s1971_s25 + $0x18] sm:$0xff]   ;;  %v1868_v13 = vld [vmem:[%s1971_s25 + $0x20] sm:$0xff]   ;;  %v1870_v15 = vld [vmem:[%s1971_s25 + $0x28] sm:$0xff]  }
  0x14   : > { %1802 = vmatmul.mubr.msk.bf16.vlgmr.msra.gmra.mrb[0].mxu1 %vm492_vm2, %v1863_v8  ;;  %1773 = vmatprep.mubr.msk.bf16.mxu0 %vm492_vm2, %v1864_v9  ;;  %v1867_v12 = vld [vmem:[%s1971_s25 + $0x98] sm:$0xff]   ;;  %v1869_v14 = vld [vmem:[%s1971_s25 + $0xa0] sm:$0xff]   ;;  %v1871_v16 = vld [vmem:[%s1971_s25 + $0xa8] sm:$0xff]  }
  0x15   : > { %1805 = vmatprep.mubr.msk.bf16.mxu1 %vm492_vm2, %v1865_v10  ;;  %v1872_v17 = vld [vmem:[%s1971_s25 + $0x30] sm:$0xff]   ;;  %v1874_v19 = vld [vmem:[%s1971_s25 + $0x38] sm:$0xff]   ;;  %v1876_v21 = vld [vmem:[%s1971_s25 + $0x40] sm:$0xff]  }
  0x16   : > { %v1873_v18 = vld [vmem:[%s1971_s25 + $0xb0] sm:$0xff]   ;;  %v1875_v20 = vld [vmem:[%s1971_s25 + $0xb8] sm:$0xff]   ;;  %v1877_v22 = vld [vmem:[%s1971_s25 + $0xc0] sm:$0xff]  }
  0x17   : > { %v1878_v23 = vld [vmem:[%s1971_s25 + $0x48] sm:$0xff]   ;;  %v1880_v25 = vld [vmem:[%s1971_s25 + $0x50] sm:$0xff]   ;;  %v1882_v27 = vld [vmem:[%s1971_s25 + $0x58] sm:$0xff]  }
  0x18   : > { %v1879_v24 = vld [vmem:[%s1971_s25 + $0xc8] sm:$0xff]   ;;  %v1881_v26 = vld [vmem:[%s1971_s25 + $0xd0] sm:$0xff]   ;;  %v1883_v28 = vld [vmem:[%s1971_s25 + $0xd8] sm:$0xff]  }
  0x19   : > { %v1884_v29 = vld [vmem:[%s1971_s25 + $0x60] sm:$0xff]   ;;  %v1886_v31 = vld [vmem:[%s1971_s25 + $0x68] sm:$0xff]   ;;  %v1888_v33 = vld [vmem:[%s1971_s25 + $0x70] sm:$0xff]  }
  0x1a   : > { %v1885_v30 = vld [vmem:[%s1971_s25 + $0xe0] sm:$0xff]   ;;  %v1887_v32 = vld [vmem:[%s1971_s25 + $0xe8] sm:$0xff]   ;;  %v1889_v34 = vld [vmem:[%s1971_s25 + $0xf0] sm:$0xff]  }
  0x1b   : > { %1774 = vmatmul.mubr.msk.bf16.gmra.mrb[4].mxu0 %vm492_vm2, %v1866_v11  ;;  %v1890_v35 = vld [vmem:[%s1971_s25 + $0x78] sm:$0xff]  }
  0x1c   : > { %1806 = vmatmul.mubr.msk.bf16.gmra.mrb[4].mxu1 %vm492_vm2, %v1867_v12  ;;  %1777 = vmatprep.mubr.msk.bf16.mxu0 %vm492_vm2, %v1868_v13  ;;  %v1891_v36 = vld [vmem:[%s1971_s25 + $0xf8] sm:$0xff]  }
  0x1d   : > { %1809 = vmatprep.mubr.msk.bf16.mxu1 %vm492_vm2, %v1869_v14 }
  0x23   : > { %1778 = vmatmul.mubr.msk.bf16.gmra.mrb[8].mxu0 %vm492_vm2, %v1870_v15 }
  0x24   : > { %1810 = vmatmul.mubr.msk.bf16.gmra.mrb[8].mxu1 %vm492_vm2, %v1871_v16  ;;  %1781 = vmatprep.mubr.msk.bf16.mxu0 %vm492_vm2, %v1872_v17 }
  0x25   : > { %1813 = vmatprep.mubr.msk.bf16.mxu1 %vm492_vm2, %v1873_v18 }
  0x2b   : > { %1782 = vmatmul.mubr.msk.bf16.gmra.mrb[12].mxu0 %vm492_vm2, %v1874_v19 }
  0x2c   : > { %1814 = vmatmul.mubr.msk.bf16.gmra.mrb[12].mxu1 %vm492_vm2, %v1875_v20  ;;  %1785 = vmatprep.mubr.msk.bf16.mxu0 %vm492_vm2, %v1876_v21 }
  0x2d   : > { %1817 = vmatprep.mubr.msk.bf16.mxu1 %vm492_vm2, %v1877_v22 }
  0x33   : > { %1786 = vmatmul.mubr.msk.bf16.gmra.mrb[16].mxu0 %vm492_vm2, %v1878_v23 }
  0x34   : > { %1818 = vmatmul.mubr.msk.bf16.gmra.mrb[16].mxu1 %vm492_vm2, %v1879_v24  ;;  %1789 = vmatprep.mubr.msk.bf16.mxu0 %vm492_vm2, %v1880_v25 }
  0x35   : > { %1821 = vmatprep.mubr.msk.bf16.mxu1 %vm492_vm2, %v1881_v26 }
  0x3b   : > { %1790 = vmatmul.mubr.msk.bf16.gmra.mrb[20].mxu0 %vm492_vm2, %v1882_v27 }
  0x3c   : > { %1822 = vmatmul.mubr.msk.bf16.gmra.mrb[20].mxu1 %vm492_vm2, %v1883_v28  ;;  %1793 = vmatprep.mubr.msk.bf16.mxu0 %vm492_vm2, %v1884_v29 }
  0x3d   : > { %1825 = vmatprep.mubr.msk.bf16.mxu1 %vm492_vm2, %v1885_v30 }
  0x43   : > { %1794 = vmatmul.mubr.msk.bf16.gmra.mrb[24].mxu0 %vm492_vm2, %v1886_v31 }
  0x44   : > { %1826 = vmatmul.mubr.msk.bf16.gmra.mrb[24].mxu1 %vm492_vm2, %v1887_v32  ;;  %1797 = vmatprep.mubr.msk.bf16.mxu0 %vm492_vm2, %v1888_v33 }
  0x45   : > { %1829 = vmatprep.mubr.msk.bf16.mxu1 %vm492_vm2, %v1889_v34 }
  0x4b   : > { %1798 = vmatmul.mubr.msk.bf16.gmra.mrb[28].mxu0 %vm492_vm2, %v1890_v35 }
  0x4c   : > { %1830 = vmatmul.mubr.msk.bf16.gmra.mrb[28].mxu1 %vm492_vm2, %v1891_v36 }
  0xe6   : > { %v1771_v38 = vpop.f32.mrb[0].mxu0 }
  0xe7   : > { %v894_v40 = vmul.f32 %v1771_v38, %v2040_v37  ;;  %v1803_v41 = vpop.f32.mrb[0].mxu1  ;;  %v630_v42 = vpop.f32.mrb[1].mxu0 }
  0xe8   : > { %v926_v43 = vmul.f32 %v1803_v41, %v2040_v37  ;;  %v892_v44 = vmul.f32 %v2040_v37, %v630_v42  ;;  %v758_v45 = vpop.f32.mrb[1].mxu1  ;;  %v1772_v46 = vpop.f32.mrb[2].mxu0 }
  0xe9   : > { %v965_v47 = vadd.f32 %v2045_v39, %v894_v40  ;;  %v924_v48 = vmul.f32 %v2040_v37, %v758_v45  ;;  %v895_v49 = vmul.f32 %v1772_v46, %v2040_v37  ;;  %v1804_v50 = vpop.f32.mrb[2].mxu1  ;;  %v633_v51 = vpop.f32.mrb[3].mxu0 }
  0xea   : > { %v997_v52 = vadd.f32 %v2045_v39, %v926_v43  ;;  %v963_v53 = vadd.f32 %v2045_v39, %v892_v44  ;;  %v927_v54 = vmul.f32 %v1804_v50, %v2040_v37  ;;  %v893_v55 = vmul.f32 %v2040_v37, %v633_v51  ;;  %v761_v56 = vpop.f32.mrb[3].mxu1 }
  0xeb   : > { %v1029_v57 = vmax.f32 %v965_v47, 0.0  ;;  %v995_v58 = vadd.f32 %v2045_v39, %v924_v48  ;;  %v966_v59 = vadd.f32 %v2045_v39, %v895_v49  ;;  %v925_v60 = vmul.f32 %v2040_v37, %v761_v56 }
  0xec   : > { %v1061_v61 = vmax.f32 %v997_v52, 0.0  ;;  %v1027_v62 = vmax.f32 %v963_v53, 0.0  ;;  %v998_v63 = vadd.f32 %v2045_v39, %v927_v54  ;;  %v964_v0 = vadd.f32 %v2045_v39, %v893_v55 }
  0xed   : > { %v1672_v1 = vpack.c.bf16 %v1029_v57, %v1029_v57  ;;  %v1059_v2 = vmax.f32 %v995_v58, 0.0  ;;  %v1030_v3 = vmax.f32 %v966_v59, 0.0  ;;  %v996_v4 = vadd.f32 %v2045_v39, %v925_v60 }
  0xee   : > { %v1704_v5 = vpack.c.bf16 %v1061_v61, %v1061_v61  ;;  %v1670_v6 = vpack.c.bf16 %v1027_v62, %v1027_v62  ;;  %v1062_v7 = vmax.f32 %v998_v63, 0.0  ;;  %v1028_v8 = vmax.f32 %v964_v0, 0.0  ;;  %v1775_v9 = vpop.f32.mrb[4].mxu0 }
  0xef   : > { %1350 = vst.msk [vmem:[%s2065_s6 + $0x8] sm:$0xf] %vm1347_vm3, %v1672_v1  ;;  %v1702_v10 = vpack.c.bf16 %v1059_v2, %v1059_v2  ;;  %v1673_v11 = vpack.c.bf16 %v1030_v3, %v1030_v3  ;;  %v1060_v12 = vmax.f32 %v996_v4, 0.0  ;;  %v898_v13 = vmul.f32 %v1775_v9, %v2040_v37  ;;  %v1807_v14 = vpop.f32.mrb[4].mxu1  ;;  %v646_v15 = vpop.f32.mrb[5].mxu0 }
  0xf0   : > { %1382 = vst.msk [vmem:[%s2065_s6 + $0x88] sm:$0xf] %vm1347_vm3, %v1704_v5  ;;  %1348 = vst.msk [vmem:[%s2065_s6] sm:$0xf] %vm1347_vm3, %v1670_v6  ;;  %v1705_v16 = vpack.c.bf16 %v1062_v7, %v1062_v7  ;;  %v1671_v17 = vpack.c.bf16 %v1028_v8, %v1028_v8  ;;  %v930_v18 = vmul.f32 %v1807_v14, %v2040_v37  ;;  %v774_v20 = vpop.f32.mrb[5].mxu1  ;;  %v1776_v21 = vpop.f32.mrb[6].mxu0 }
  0xf1   : > { %v896_v19 = vmul.f32 %v2040_v37, %v646_v15  ;;  %1380 = vst.msk [vmem:[%s2065_s6 + $0x80] sm:$0xf] %vm1347_vm3, %v1702_v10  ;;  %1351 = vst.msk [vmem:[%s2065_s6 + $0xc] sm:$0xf] %vm1347_vm3, %v1673_v11  ;;  %v1703_v22 = vpack.c.bf16 %v1060_v12, %v1060_v12  ;;  %v969_v23 = vadd.f32 %v2045_v39, %v898_v13  ;;  %v1808_v26 = vpop.f32.mrb[6].mxu1  ;;  %v649_v27 = vpop.f32.mrb[7].mxu0 }
  0xf2   : > { %v928_v24 = vmul.f32 %v2040_v37, %v774_v20  ;;  %v899_v25 = vmul.f32 %v1776_v21, %v2040_v37  ;;  %1383 = vst.msk [vmem:[%s2065_s6 + $0x8c] sm:$0xf] %vm1347_vm3, %v1705_v16  ;;  %1349 = vst.msk [vmem:[%s2065_s6 + $0x4] sm:$0xf] %vm1347_vm3, %v1671_v17  ;;  %v1001_v28 = vadd.f32 %v2045_v39, %v930_v18  ;;  %v777_v32 = vpop.f32.mrb[7].mxu1 }
  0xf3   : > { %v967_v29 = vadd.f32 %v2045_v39, %v896_v19  ;;  %v931_v30 = vmul.f32 %v1808_v26, %v2040_v37  ;;  %v897_v31 = vmul.f32 %v2040_v37, %v649_v27  ;;  %1381 = vst.msk [vmem:[%s2065_s6 + $0x84] sm:$0xf] %vm1347_vm3, %v1703_v22  ;;  %v1033_v33 = vmax.f32 %v969_v23, 0.0 }
  0xf4   : > { %v999_v34 = vadd.f32 %v2045_v39, %v928_v24  ;;  %v970_v35 = vadd.f32 %v2045_v39, %v899_v25  ;;  %v929_v36 = vmul.f32 %v2040_v37, %v777_v32  ;;  %v1065_v38 = vmax.f32 %v1001_v28, 0.0 }
  0xf5   : > { %v1031_v40 = vmax.f32 %v967_v29, 0.0  ;;  %v1002_v41 = vadd.f32 %v2045_v39, %v931_v30  ;;  %v968_v42 = vadd.f32 %v2045_v39, %v897_v31  ;;  %v1676_v43 = vpack.c.bf16 %v1033_v33, %v1033_v33 }
  0xf6   : > { %v1063_v44 = vmax.f32 %v999_v34, 0.0  ;;  %v1034_v45 = vmax.f32 %v970_v35, 0.0  ;;  %v1000_v46 = vadd.f32 %v2045_v39, %v929_v36  ;;  %v1708_v47 = vpack.c.bf16 %v1065_v38, %v1065_v38  ;;  %v1779_v51 = vpop.f32.mrb[8].mxu0 }
  0xf7   : > { %v1674_v48 = vpack.c.bf16 %v1031_v40, %v1031_v40  ;;  %v1066_v49 = vmax.f32 %v1002_v41, 0.0  ;;  %v1032_v50 = vmax.f32 %v968_v42, 0.0  ;;  %1354 = vst.msk [vmem:[%s2065_s6 + $0x18] sm:$0xf] %vm1347_vm3, %v1676_v43  ;;  %v902_v55 = vmul.f32 %v1779_v51, %v2040_v37  ;;  %v1811_v56 = vpop.f32.mrb[8].mxu1  ;;  %v662_v57 = vpop.f32.mrb[9].mxu0 }
  0xf8   : > { %v1706_v52 = vpack.c.bf16 %v1063_v44, %v1063_v44  ;;  %v1677_v53 = vpack.c.bf16 %v1034_v45, %v1034_v45  ;;  %v1064_v54 = vmax.f32 %v1000_v46, 0.0  ;;  %1386 = vst.msk [vmem:[%s2065_s6 + $0x98] sm:$0xf] %vm1347_vm3, %v1708_v47  ;;  %v934_v60 = vmul.f32 %v1811_v56, %v2040_v37  ;;  %v790_v62 = vpop.f32.mrb[9].mxu1  ;;  %v1780_v63 = vpop.f32.mrb[10].mxu0 }
  0xf9   : > { %1352 = vst.msk [vmem:[%s2065_s6 + $0x10] sm:$0xf] %vm1347_vm3, %v1674_v48  ;;  %v1709_v58 = vpack.c.bf16 %v1066_v49, %v1066_v49  ;;  %v1675_v59 = vpack.c.bf16 %v1032_v50, %v1032_v50  ;;  %v900_v61 = vmul.f32 %v2040_v37, %v662_v57  ;;  %v973_v1 = vadd.f32 %v2045_v39, %v902_v55  ;;  %v1812_v4 = vpop.f32.mrb[10].mxu1  ;;  %v665_v5 = vpop.f32.mrb[11].mxu0 }
  0xfa   : > { %1384 = vst.msk [vmem:[%s2065_s6 + $0x90] sm:$0xf] %vm1347_vm3, %v1706_v52  ;;  %1355 = vst.msk [vmem:[%s2065_s6 + $0x1c] sm:$0xf] %vm1347_vm3, %v1677_v53  ;;  %v1707_v0 = vpack.c.bf16 %v1064_v54, %v1064_v54  ;;  %v932_v2 = vmul.f32 %v2040_v37, %v790_v62  ;;  %v903_v3 = vmul.f32 %v1780_v63, %v2040_v37  ;;  %v793_v10 = vpop.f32.mrb[11].mxu1 }
  0xfb   : > { %1387 = vst.msk [vmem:[%s2065_s6 + $0x9c] sm:$0xf] %vm1347_vm3, %v1709_v58  ;;  %1353 = vst.msk [vmem:[%s2065_s6 + $0x14] sm:$0xf] %vm1347_vm3, %v1675_v59  ;;  %v1005_v6 = vadd.f32 %v2045_v39, %v934_v60  ;;  %v971_v7 = vadd.f32 %v2045_v39, %v900_v61  ;;  %v935_v8 = vmul.f32 %v1812_v4, %v2040_v37  ;;  %v1037_v11 = vmax.f32 %v973_v1, 0.0 }
  0xfc   : > { %v901_v9 = vmul.f32 %v2040_v37, %v665_v5  ;;  %1385 = vst.msk [vmem:[%s2065_s6 + $0x94] sm:$0xf] %vm1347_vm3, %v1707_v0  ;;  %v1003_v12 = vadd.f32 %v2045_v39, %v932_v2  ;;  %v974_v13 = vadd.f32 %v2045_v39, %v903_v3  ;;  %v933_v14 = vmul.f32 %v2040_v37, %v793_v10 }
  0xfd   : > { %v1069_v15 = vmax.f32 %v1005_v6, 0.0  ;;  %v1035_v16 = vmax.f32 %v971_v7, 0.0  ;;  %v1006_v17 = vadd.f32 %v2045_v39, %v935_v8  ;;  %v1680_v19 = vpack.c.bf16 %v1037_v11, %v1037_v11 }
  0xfe   : > { %v972_v18 = vadd.f32 %v2045_v39, %v901_v9  ;;  %v1067_v20 = vmax.f32 %v1003_v12, 0.0  ;;  %v1038_v21 = vmax.f32 %v974_v13, 0.0  ;;  %v1004_v22 = vadd.f32 %v2045_v39, %v933_v14  ;;  %v1783_v27 = vpop.f32.mrb[12].mxu0 }
  0xff   : > { %v1712_v23 = vpack.c.bf16 %v1069_v15, %v1069_v15  ;;  %v1678_v24 = vpack.c.bf16 %v1035_v16, %v1035_v16  ;;  %v1070_v25 = vmax.f32 %v1006_v17, 0.0  ;;  %1358 = vst.msk [vmem:[%s2065_s6 + $0x28] sm:$0xf] %vm1347_vm3, %v1680_v19  ;;  %v906_v31 = vmul.f32 %v1783_v27, %v2040_v37  ;;  %v1815_v32 = vpop.f32.mrb[12].mxu1  ;;  %v678_v33 = vpop.f32.mrb[13].mxu0 }
 0x100   : > { %v1036_v26 = vmax.f32 %v972_v18, 0.0  ;;  %v1710_v28 = vpack.c.bf16 %v1067_v20, %v1067_v20  ;;  %v1681_v29 = vpack.c.bf16 %v1038_v21, %v1038_v21  ;;  %v1068_v30 = vmax.f32 %v1004_v22, 0.0  ;;  %v806_v40 = vpop.f32.mrb[13].mxu1  ;;  %v1784_v41 = vpop.f32.mrb[14].mxu0 }
 0x101   : > { %1390 = vst.msk [vmem:[%s2065_s6 + $0xa8] sm:$0xf] %vm1347_vm3, %v1712_v23  ;;  %1356 = vst.msk [vmem:[%s2065_s6 + $0x20] sm:$0xf] %vm1347_vm3, %v1678_v24  ;;  %v1713_v34 = vpack.c.bf16 %v1070_v25, %v1070_v25  ;;  %v938_v36 = vmul.f32 %v1815_v32, %v2040_v37  ;;  %v904_v38 = vmul.f32 %v2040_v37, %v678_v33  ;;  %v1816_v46 = vpop.f32.mrb[14].mxu1  ;;  %v681_v47 = vpop.f32.mrb[15].mxu0 }
 0x102   : > { %v1679_v35 = vpack.c.bf16 %v1036_v26, %v1036_v26  ;;  %1388 = vst.msk [vmem:[%s2065_s6 + $0xa0] sm:$0xf] %vm1347_vm3, %v1710_v28  ;;  %1359 = vst.msk [vmem:[%s2065_s6 + $0x2c] sm:$0xf] %vm1347_vm3, %v1681_v29  ;;  %v1711_v42 = vpack.c.bf16 %v1068_v30, %v1068_v30  ;;  %v977_v43 = vadd.f32 %v2045_v39, %v906_v31  ;;  %v809_v52 = vpop.f32.mrb[15].mxu1 }
 0x103   : > { %v936_v44 = vmul.f32 %v2040_v37, %v806_v40  ;;  %v907_v45 = vmul.f32 %v1784_v41, %v2040_v37  ;;  %1391 = vst.msk [vmem:[%s2065_s6 + $0xac] sm:$0xf] %vm1347_vm3, %v1713_v34  ;;  %v1009_v48 = vadd.f32 %v2045_v39, %v938_v36  ;;  %v975_v49 = vadd.f32 %v2045_v39, %v904_v38 }
 0x104   : > { %1357 = vst.msk [vmem:[%s2065_s6 + $0x24] sm:$0xf] %vm1347_vm3, %v1679_v35  ;;  %v939_v50 = vmul.f32 %v1816_v46, %v2040_v37  ;;  %v905_v51 = vmul.f32 %v2040_v37, %v681_v47  ;;  %1389 = vst.msk [vmem:[%s2065_s6 + $0xa4] sm:$0xf] %vm1347_vm3, %v1711_v42  ;;  %v1041_v53 = vmax.f32 %v977_v43, 0.0  ;;  %v937_v56 = vmul.f32 %v2040_v37, %v809_v52 }
 0x105   : > { %v1007_v54 = vadd.f32 %v2045_v39, %v936_v44  ;;  %v978_v55 = vadd.f32 %v2045_v39, %v907_v45  ;;  %v1073_v57 = vmax.f32 %v1009_v48, 0.0  ;;  %v1039_v58 = vmax.f32 %v975_v49, 0.0 }
 0x106   : > { %v1010_v59 = vadd.f32 %v2045_v39, %v939_v50  ;;  %v976_v60 = vadd.f32 %v2045_v39, %v905_v51  ;;  %v1684_v61 = vpack.c.bf16 %v1041_v53, %v1041_v53  ;;  %v1008_v0 = vadd.f32 %v2045_v39, %v937_v56  ;;  %v1787_v5 = vpop.f32.mrb[16].mxu0 }
 0x107   : > { %v1071_v62 = vmax.f32 %v1007_v54, 0.0  ;;  %v1042_v63 = vmax.f32 %v978_v55, 0.0  ;;  %v1716_v1 = vpack.c.bf16 %v1073_v57, %v1073_v57  ;;  %v1682_v2 = vpack.c.bf16 %v1039_v58, %v1039_v58  ;;  %v1819_v10 = vpop.f32.mrb[16].mxu1  ;;  %v694_v11 = vpop.f32.mrb[17].mxu0 }
 0x108   : > { %v1074_v3 = vmax.f32 %v1010_v59, 0.0  ;;  %v1040_v4 = vmax.f32 %v976_v60, 0.0  ;;  %1362 = vst.msk [vmem:[%s2065_s6 + $0x38] sm:$0xf] %vm1347_vm3, %v1684_v61  ;;  %v1072_v8 = vmax.f32 %v1008_v0, 0.0  ;;  %v910_v9 = vmul.f32 %v1787_v5, %v2040_v37  ;;  %v822_v16 = vpop.f32.mrb[17].mxu1 }
 0x109   : > { %v1714_v6 = vpack.c.bf16 %v1071_v62, %v1071_v62  ;;  %v1685_v7 = vpack.c.bf16 %v1042_v63, %v1042_v63  ;;  %1394 = vst.msk [vmem:[%s2065_s6 + $0xb8] sm:$0xf] %vm1347_vm3, %v1716_v1  ;;  %1360 = vst.msk [vmem:[%s2065_s6 + $0x30] sm:$0xf] %vm1347_vm3, %v1682_v2  ;;  %v942_v14 = vmul.f32 %v1819_v10, %v2040_v37  ;;  %v1788_v17 = vpop.f32.mrb[18].mxu0  ;;  %v1820_v22 = vpop.f32.mrb[18].mxu1 }
 0x10a   : > { %v1717_v12 = vpack.c.bf16 %v1074_v3, %v1074_v3  ;;  %v1683_v13 = vpack.c.bf16 %v1040_v4, %v1040_v4  ;;  %v908_v15 = vmul.f32 %v2040_v37, %v694_v11  ;;  %v1715_v18 = vpack.c.bf16 %v1072_v8, %v1072_v8  ;;  %v697_v23 = vpop.f32.mrb[19].mxu0  ;;  %v825_v28 = vpop.f32.mrb[19].mxu1 }
 0x10b   : > { %1392 = vst.msk [vmem:[%s2065_s6 + $0xb0] sm:$0xf] %vm1347_vm3, %v1714_v6  ;;  %1363 = vst.msk [vmem:[%s2065_s6 + $0x3c] sm:$0xf] %vm1347_vm3, %v1685_v7  ;;  %v981_v19 = vadd.f32 %v2045_v39, %v910_v9  ;;  %v940_v20 = vmul.f32 %v2040_v37, %v822_v16  ;;  %v911_v21 = vmul.f32 %v1788_v17, %v2040_v37 }
 0x10c   : > { %1395 = vst.msk [vmem:[%s2065_s6 + $0xbc] sm:$0xf] %vm1347_vm3, %v1717_v12  ;;  %1361 = vst.msk [vmem:[%s2065_s6 + $0x34] sm:$0xf] %vm1347_vm3, %v1683_v13  ;;  %v1013_v24 = vadd.f32 %v2045_v39, %v942_v14  ;;  %v979_v25 = vadd.f32 %v2045_v39, %v908_v15  ;;  %v943_v26 = vmul.f32 %v1820_v22, %v2040_v37 }
 0x10d   : > { %v909_v27 = vmul.f32 %v2040_v37, %v697_v23  ;;  %1393 = vst.msk [vmem:[%s2065_s6 + $0xb4] sm:$0xf] %vm1347_vm3, %v1715_v18  ;;  %v1045_v29 = vmax.f32 %v981_v19, 0.0  ;;  %v1011_v30 = vadd.f32 %v2045_v39, %v940_v20  ;;  %v982_v31 = vadd.f32 %v2045_v39, %v911_v21 }
 0x10e   : > { %v941_v32 = vmul.f32 %v2040_v37, %v825_v28  ;;  %v1077_v33 = vmax.f32 %v1013_v24, 0.0  ;;  %v1043_v34 = vmax.f32 %v979_v25, 0.0  ;;  %v1014_v35 = vadd.f32 %v2045_v39, %v943_v26  ;;  %v1791_v47 = vpop.f32.mrb[20].mxu0 }
 0x10f   : > { %v980_v36 = vadd.f32 %v2045_v39, %v909_v27  ;;  %v1688_v38 = vpack.c.bf16 %v1045_v29, %v1045_v29  ;;  %v1075_v40 = vmax.f32 %v1011_v30, 0.0  ;;  %v1046_v41 = vmax.f32 %v982_v31, 0.0  ;;  %v1823_v52 = vpop.f32.mrb[20].mxu1  ;;  %v710_v53 = vpop.f32.mrb[21].mxu0 }
 0x110   : > { %v1012_v42 = vadd.f32 %v2045_v39, %v941_v32  ;;  %v1720_v43 = vpack.c.bf16 %v1077_v33, %v1077_v33  ;;  %v1686_v44 = vpack.c.bf16 %v1043_v34, %v1043_v34  ;;  %v1078_v45 = vmax.f32 %v1014_v35, 0.0  ;;  %v838_v58 = vpop.f32.mrb[21].mxu1  ;;  %v1792_v59 = vpop.f32.mrb[22].mxu0 }
 0x111   : > { %v1044_v46 = vmax.f32 %v980_v36, 0.0  ;;  %1366 = vst.msk [vmem:[%s2065_s6 + $0x48] sm:$0xf] %vm1347_vm3, %v1688_v38  ;;  %v1718_v48 = vpack.c.bf16 %v1075_v40, %v1075_v40  ;;  %v1689_v49 = vpack.c.bf16 %v1046_v41, %v1046_v41  ;;  %v914_v51 = vmul.f32 %v1791_v47, %v2040_v37  ;;  %v1824_v0 = vpop.f32.mrb[22].mxu1  ;;  %v713_v1 = vpop.f32.mrb[23].mxu0 }
 0x112   : > { %v1076_v50 = vmax.f32 %v1012_v42, 0.0  ;;  %1398 = vst.msk [vmem:[%s2065_s6 + $0xc8] sm:$0xf] %vm1347_vm3, %v1720_v43  ;;  %1364 = vst.msk [vmem:[%s2065_s6 + $0x40] sm:$0xf] %vm1347_vm3, %v1686_v44  ;;  %v1721_v54 = vpack.c.bf16 %v1078_v45, %v1078_v45  ;;  %v946_v56 = vmul.f32 %v1823_v52, %v2040_v37  ;;  %v912_v57 = vmul.f32 %v2040_v37, %v710_v53  ;;  %v841_v6 = vpop.f32.mrb[23].mxu1 }
 0x113   : > { %v1687_v55 = vpack.c.bf16 %v1044_v46, %v1044_v46  ;;  %1396 = vst.msk [vmem:[%s2065_s6 + $0xc0] sm:$0xf] %vm1347_vm3, %v1718_v48  ;;  %1367 = vst.msk [vmem:[%s2065_s6 + $0x4c] sm:$0xf] %vm1347_vm3, %v1689_v49  ;;  %v985_v61 = vadd.f32 %v2045_v39, %v914_v51  ;;  %v944_v62 = vmul.f32 %v2040_v37, %v838_v58 }
 0x114   : > { %v1719_v60 = vpack.c.bf16 %v1076_v50, %v1076_v50  ;;  %v915_v63 = vmul.f32 %v1792_v59, %v2040_v37  ;;  %1399 = vst.msk [vmem:[%s2065_s6 + $0xcc] sm:$0xf] %vm1347_vm3, %v1721_v54  ;;  %v1017_v2 = vadd.f32 %v2045_v39, %v946_v56  ;;  %v983_v3 = vadd.f32 %v2045_v39, %v912_v57 }
 0x115   : > { %1365 = vst.msk [vmem:[%s2065_s6 + $0x44] sm:$0xf] %vm1347_vm3, %v1687_v55  ;;  %v947_v4 = vmul.f32 %v1824_v0, %v2040_v37  ;;  %v913_v5 = vmul.f32 %v2040_v37, %v713_v1  ;;  %v1049_v7 = vmax.f32 %v985_v61, 0.0  ;;  %v1015_v8 = vadd.f32 %v2045_v39, %v944_v62 }
 0x116   : > { %1397 = vst.msk [vmem:[%s2065_s6 + $0xc4] sm:$0xf] %vm1347_vm3, %v1719_v60  ;;  %v986_v9 = vadd.f32 %v2045_v39, %v915_v63  ;;  %v945_v10 = vmul.f32 %v2040_v37, %v841_v6  ;;  %v1081_v11 = vmax.f32 %v1017_v2, 0.0  ;;  %v1047_v12 = vmax.f32 %v983_v3, 0.0  ;;  %v1795_v23 = vpop.f32.mrb[24].mxu0 }
 0x117   : > { %v1018_v13 = vadd.f32 %v2045_v39, %v947_v4  ;;  %v984_v14 = vadd.f32 %v2045_v39, %v913_v5  ;;  %v1692_v15 = vpack.c.bf16 %v1049_v7, %v1049_v7  ;;  %v1079_v16 = vmax.f32 %v1015_v8, 0.0  ;;  %v1827_v28 = vpop.f32.mrb[24].mxu1  ;;  %v726_v29 = vpop.f32.mrb[25].mxu0 }
 0x118   : > { %v1050_v17 = vmax.f32 %v986_v9, 0.0  ;;  %v1016_v18 = vadd.f32 %v2045_v39, %v945_v10  ;;  %v1724_v19 = vpack.c.bf16 %v1081_v11, %v1081_v11  ;;  %v1690_v20 = vpack.c.bf16 %v1047_v12, %v1047_v12  ;;  %v854_v34 = vpop.f32.mrb[25].mxu1  ;;  %v1796_v35 = vpop.f32.mrb[26].mxu0 }
 0x119   : > { %v1082_v21 = vmax.f32 %v1018_v13, 0.0  ;;  %v1048_v22 = vmax.f32 %v984_v14, 0.0  ;;  %1370 = vst.msk [vmem:[%s2065_s6 + $0x58] sm:$0xf] %vm1347_vm3, %v1692_v15  ;;  %v1722_v24 = vpack.c.bf16 %v1079_v16, %v1079_v16  ;;  %v918_v27 = vmul.f32 %v1795_v23, %v2040_v37  ;;  %v1828_v42 = vpop.f32.mrb[26].mxu1  ;;  %v729_v43 = vpop.f32.mrb[27].mxu0 }
 0x11a   : > { %v1693_v25 = vpack.c.bf16 %v1050_v17, %v1050_v17  ;;  %v1080_v26 = vmax.f32 %v1016_v18, 0.0  ;;  %1402 = vst.msk [vmem:[%s2065_s6 + $0xd8] sm:$0xf] %vm1347_vm3, %v1724_v19  ;;  %1368 = vst.msk [vmem:[%s2065_s6 + $0x50] sm:$0xf] %vm1347_vm3, %v1690_v20  ;;  %v950_v32 = vmul.f32 %v1827_v28, %v2040_v37  ;;  %v916_v33 = vmul.f32 %v2040_v37, %v726_v29  ;;  %v857_v48 = vpop.f32.mrb[27].mxu1 }
 0x11b   : > { %v1725_v30 = vpack.c.bf16 %v1082_v21, %v1082_v21  ;;  %v1691_v31 = vpack.c.bf16 %v1048_v22, %v1048_v22  ;;  %1400 = vst.msk [vmem:[%s2065_s6 + $0xd0] sm:$0xf] %vm1347_vm3, %v1722_v24  ;;  %v989_v38 = vadd.f32 %v2045_v39, %v918_v27  ;;  %v948_v40 = vmul.f32 %v2040_v37, %v854_v34 }
 0x11c   : > { %1371 = vst.msk [vmem:[%s2065_s6 + $0x5c] sm:$0xf] %vm1347_vm3, %v1693_v25  ;;  %v1723_v36 = vpack.c.bf16 %v1080_v26, %v1080_v26  ;;  %v919_v41 = vmul.f32 %v1796_v35, %v2040_v37  ;;  %v1021_v44 = vadd.f32 %v2045_v39, %v950_v32  ;;  %v987_v45 = vadd.f32 %v2045_v39, %v916_v33 }
 0x11d   : > { %1403 = vst.msk [vmem:[%s2065_s6 + $0xdc] sm:$0xf] %vm1347_vm3, %v1725_v30  ;;  %1369 = vst.msk [vmem:[%s2065_s6 + $0x54] sm:$0xf] %vm1347_vm3, %v1691_v31  ;;  %v951_v46 = vmul.f32 %v1828_v42, %v2040_v37  ;;  %v917_v47 = vmul.f32 %v2040_v37, %v729_v43  ;;  %v1053_v49 = vmax.f32 %v989_v38, 0.0  ;;  %v1019_v50 = vadd.f32 %v2045_v39, %v948_v40 }
 0x11e   : > { %1401 = vst.msk [vmem:[%s2065_s6 + $0xd4] sm:$0xf] %vm1347_vm3, %v1723_v36  ;;  %v990_v51 = vadd.f32 %v2045_v39, %v919_v41  ;;  %v949_v52 = vmul.f32 %v2040_v37, %v857_v48  ;;  %v1085_v53 = vmax.f32 %v1021_v44, 0.0  ;;  %v1051_v54 = vmax.f32 %v987_v45, 0.0  ;;  %v1799_v1 = vpop.f32.mrb[28].mxu0 }
 0x11f   : > { %v1022_v55 = vadd.f32 %v2045_v39, %v951_v46  ;;  %v988_v56 = vadd.f32 %v2045_v39, %v917_v47  ;;  %v1696_v57 = vpack.c.bf16 %v1053_v49, %v1053_v49  ;;  %v1083_v58 = vmax.f32 %v1019_v50, 0.0  ;;  %v1831_v6 = vpop.f32.mrb[28].mxu1  ;;  %v742_v7 = vpop.f32.mrb[29].mxu0 }
 0x120   : > { %v1054_v59 = vmax.f32 %v990_v51, 0.0  ;;  %v1020_v60 = vadd.f32 %v2045_v39, %v949_v52  ;;  %v1728_v61 = vpack.c.bf16 %v1085_v53, %v1085_v53  ;;  %v1694_v62 = vpack.c.bf16 %v1051_v54, %v1051_v54  ;;  %v870_v12 = vpop.f32.mrb[29].mxu1  ;;  %v1800_v13 = vpop.f32.mrb[30].mxu0 }
 0x121   : > { %v1086_v63 = vmax.f32 %v1022_v55, 0.0  ;;  %v1052_v0 = vmax.f32 %v988_v56, 0.0  ;;  %1374 = vst.msk [vmem:[%s2065_s6 + $0x68] sm:$0xf] %vm1347_vm3, %v1696_v57  ;;  %v1726_v2 = vpack.c.bf16 %v1083_v58, %v1083_v58  ;;  %v922_v5 = vmul.f32 %v1799_v1, %v2040_v37  ;;  %v1832_v18 = vpop.f32.mrb[30].mxu1  ;;  %v745_v19 = vpop.f32.mrb[31].mxu0 }
 0x122   : > { %v1697_v3 = vpack.c.bf16 %v1054_v59, %v1054_v59  ;;  %v1084_v4 = vmax.f32 %v1020_v60, 0.0  ;;  %1406 = vst.msk [vmem:[%s2065_s6 + $0xe8] sm:$0xf] %vm1347_vm3, %v1728_v61  ;;  %1372 = vst.msk [vmem:[%s2065_s6 + $0x60] sm:$0xf] %vm1347_vm3, %v1694_v62  ;;  %v954_v10 = vmul.f32 %v1831_v6, %v2040_v37  ;;  %v920_v11 = vmul.f32 %v2040_v37, %v742_v7  ;;  %v873_v24 = vpop.f32.mrb[31].mxu1 }
 0x123   : > { %v1729_v8 = vpack.c.bf16 %v1086_v63, %v1086_v63  ;;  %v1695_v9 = vpack.c.bf16 %v1052_v0, %v1052_v0  ;;  %1404 = vst.msk [vmem:[%s2065_s6 + $0xe0] sm:$0xf] %vm1347_vm3, %v1726_v2  ;;  %v993_v15 = vadd.f32 %v2045_v39, %v922_v5  ;;  %v952_v16 = vmul.f32 %v2040_v37, %v870_v12 }
 0x124   : > { %1375 = vst.msk [vmem:[%s2065_s6 + $0x6c] sm:$0xf] %vm1347_vm3, %v1697_v3  ;;  %v1727_v14 = vpack.c.bf16 %v1084_v4, %v1084_v4  ;;  %v923_v17 = vmul.f32 %v1800_v13, %v2040_v37  ;;  %v1025_v20 = vadd.f32 %v2045_v39, %v954_v10  ;;  %v991_v21 = vadd.f32 %v2045_v39, %v920_v11 }
 0x125   : > { %1407 = vst.msk [vmem:[%s2065_s6 + $0xec] sm:$0xf] %vm1347_vm3, %v1729_v8  ;;  %1373 = vst.msk [vmem:[%s2065_s6 + $0x64] sm:$0xf] %vm1347_vm3, %v1695_v9  ;;  %v955_v22 = vmul.f32 %v1832_v18, %v2040_v37  ;;  %v921_v23 = vmul.f32 %v2040_v37, %v745_v19  ;;  %v1057_v25 = vmax.f32 %v993_v15, 0.0  ;;  %v1023_v26 = vadd.f32 %v2045_v39, %v952_v16 }
 0x126   : > { %1405 = vst.msk [vmem:[%s2065_s6 + $0xe4] sm:$0xf] %vm1347_vm3, %v1727_v14  ;;  %v994_v27 = vadd.f32 %v2045_v39, %v923_v17  ;;  %v953_v28 = vmul.f32 %v2040_v37, %v873_v24  ;;  %v1089_v29 = vmax.f32 %v1025_v20, 0.0  ;;  %v1055_v30 = vmax.f32 %v991_v21, 0.0 }
 0x127   : > { %v1026_v31 = vadd.f32 %v2045_v39, %v955_v22  ;;  %v992_v32 = vadd.f32 %v2045_v39, %v921_v23  ;;  %v1700_v33 = vpack.c.bf16 %v1057_v25, %v1057_v25  ;;  %v1087_v34 = vmax.f32 %v1023_v26, 0.0 }
 0x128   : > { %v1058_v35 = vmax.f32 %v994_v27, 0.0  ;;  %v1024_v36 = vadd.f32 %v2045_v39, %v953_v28  ;;  %v1732_v38 = vpack.c.bf16 %v1089_v29, %v1089_v29  ;;  %v1698_v40 = vpack.c.bf16 %v1055_v30, %v1055_v30 }
 0x129   : > { %v1090_v37 = vmax.f32 %v1026_v31, 0.0  ;;  %v1056_v41 = vmax.f32 %v992_v32, 0.0  ;;  %1378 = vst.msk [vmem:[%s2065_s6 + $0x78] sm:$0xf] %vm1347_vm3, %v1700_v33  ;;  %v1730_v42 = vpack.c.bf16 %v1087_v34, %v1087_v34 }
 0x12a   : > { %v1701_v43 = vpack.c.bf16 %v1058_v35, %v1058_v35  ;;  %v1088_v44 = vmax.f32 %v1024_v36, 0.0  ;;  %1410 = vst.msk [vmem:[%s2065_s6 + $0xf8] sm:$0xf] %vm1347_vm3, %v1732_v38  ;;  %1376 = vst.msk [vmem:[%s2065_s6 + $0x70] sm:$0xf] %vm1347_vm3, %v1698_v40 }
 0x12b   : > { %v1733_v45 = vpack.c.bf16 %v1090_v37, %v1090_v37  ;;  %v1699_v46 = vpack.c.bf16 %v1056_v41, %v1056_v41  ;;  %1408 = vst.msk [vmem:[%s2065_s6 + $0xf0] sm:$0xf] %vm1347_vm3, %v1730_v42 }
 0x12c   : > { %1379 = vst.msk [vmem:[%s2065_s6 + $0x7c] sm:$0xf] %vm1347_vm3, %v1701_v43  ;;  %v1731_v39 = vpack.c.bf16 %v1088_v44, %v1088_v44 }
 0x12d   : > { %1411 = vst.msk [vmem:[%s2065_s6 + $0xfc] sm:$0xf] %vm1347_vm3, %v1733_v45  ;;  %1377 = vst.msk [vmem:[%s2065_s6 + $0x74] sm:$0xf] %vm1347_vm3, %v1699_v46 }
 0x12e   : > { %1409 = vst.msk [vmem:[%s2065_s6 + $0xf4] sm:$0xf] %vm1347_vm3, %v1731_v39 }
 0x12f PF: > { %s14_s17 = sadd.s32 1, %s1914_s17   ;;  %s2324_s15 = smov %s1910_s16 }
 0x130   : > { %p11_p5 = scmp.ge.s32.totalorder %s14_s17, 5   ;;  %s2325_s16 = smov %s2327_s18 }
 0x132   :  { %13 = sbr.rel (!%p11_p5) target bundleno = 2 (0x2), region = 75 }

</bundles_post_ra>
